<compile_context>
chip_gen: v7x
topology: tpu7x:2x2x1
jax: 0.10.0
libtpu: 0.0.40
codegen_flags: <defaults>
</compile_context>

<pallas_src>
from typing import NamedTuple, Optional

import jax
import jax.numpy as jnp
from jax.experimental import pallas as pl
from jax.experimental.pallas import tpu as pltpu


def _round_up(x: int, m: int) -> int:
    return ((x + m - 1) // m) * m


def _sublane_pack(dtype) -> int:
    # f32 -> 8, bf16 -> 16, int8/fp8 -> 32 sublane packing.
    return max(8, 32 // jnp.dtype(dtype).itemsize)


def _vmem_budget_bytes() -> int:
    """Per-generation VMEM budget for the pipelined resident set."""
    try:
        cap = int(pltpu.get_tpu_info().vmem_capacity_bytes)
    except Exception:
        cap = 64 << 20  # conservative fallback: v7x per-TensorCore VMEM
    # Leave ~30% headroom for compiler scratch / pipeline internals:
    # 128 MiB chips (v5e/v6e) -> ~89 MiB budget, 64 MiB chips (v7x) -> ~44 MiB.
    return min(int(cap * 0.7), 96 << 20)


# ---------------------------------------------------------------------------
# Kernels
# ---------------------------------------------------------------------------
def _linear_kernel_f32_out(x_ref, w_ref, b_ref, o_ref):
    # f32 output: accumulate directly into the resident output tile (its block
    # index (i, j) is invariant along the K grid axis), initialized with bias.
    k = pl.program_id(2)

    @pl.when(k == 0)
    def _():
        o_ref[...] = jnp.broadcast_to(b_ref[...], o_ref.shape)

    o_ref[...] += jnp.dot(
        x_ref[...], w_ref[...], preferred_element_type=jnp.float32
    )


def _linear_kernel_acc(x_ref, w_ref, b_ref, o_ref, acc_ref):
    # Narrow output dtype (e.g. bf16): keep an f32 VMEM accumulator,
    # initialized with bias at k==0, cast on the final K step.
    k = pl.program_id(2)

    @pl.when(k == 0)
    def _():
        acc_ref[...] = jnp.broadcast_to(b_ref[...], acc_ref.shape)

    acc_ref[...] += jnp.dot(
        x_ref[...], w_ref[...], preferred_element_type=jnp.float32
    )

    @pl.when(k == pl.num_programs(2) - 1)
    def _():
        o_ref[...] = acc_ref[...].astype(o_ref.dtype)


# ---------------------------------------------------------------------------
# Parameter preparation (one-time) + forward
# ---------------------------------------------------------------------------
class ClassifierParams(NamedTuple):
    w: jax.Array          # [Kp, Np], cast + zero-padded once
    b2d: jax.Array        # [1, Np], f32, zero-padded once
    input_dim: int
    num_classes: int
    tk: int
    tn: int
    compute_dtype: Optional[jnp.dtype]


def prepare_classifier_params(w, b, *, compute_dtype=None, tk_max=None, tn_max=512):
    """One-time weight packing for classifier_forward.

    w: [input_dim, num_classes] (transpose of PyTorch's Linear weight).
    b: [num_classes].
    compute_dtype: optional MXU input dtype (e.g. jnp.bfloat16 - a win on all
    of v5e/v6e/v7x); accumulation stays f32. Casting/padding here avoids a
    full HBM read+write of the weight on every forward call.
    """
    D, C = w.shape
    assert b.shape == (C,)
    if compute_dtype is not None:
        w = w.astype(compute_dtype)
    in_itemsize = jnp.dtype(w.dtype).itemsize
    if tk_max is None:
        tk_max = 2048 if in_itemsize <= 2 else 1024
    tn_max = max(128, tn_max)

    tk = min(tk_max, _round_up(D, 128))
    tn = min(tn_max, _round_up(C, 128))
    Kp = _round_up(D, tk)
    Np = _round_up(C, tn)

    if (Kp, Np) != (D, C):
        w = jnp.pad(w, ((0, Kp - D), (0, Np - C)))
    b2d = jnp.pad(b.astype(jnp.float32), (0, Np - C)).reshape(1, Np)
    return ClassifierParams(w, b2d, D, C, tk, tn, compute_dtype)


def classifier_forward(x, params: ClassifierParams, *, tm_max=512):
    """y = x @ w + b (nn.Linear forward) via a tiled Pallas TPU matmul.

    x: [B, input_dim]; output keeps x's original dtype.
    """
    B, D = x.shape
    assert D == params.input_dim
    C = params.num_classes
    out_dtype = x.dtype

    if params.compute_dtype is not None:
        x = x.astype(params.compute_dtype)

    w, b2d = params.w, params.b2d
    Kp, Np = w.shape
    tk, tn = params.tk, params.tn

    x_itemsize = jnp.dtype(x.dtype).itemsize
    w_itemsize = jnp.dtype(w.dtype).itemsize
    out_itemsize = jnp.dtype(out_dtype).itemsize
    use_acc = out_dtype != jnp.float32

    pack = _sublane_pack(x.dtype)
    tm = min(tm_max, _round_up(B, pack))

    # Fit the resident set (double-buffered tiles + accumulator) inside the
    # per-generation VMEM budget. Shrink tk first (does not change HBM
    # traffic), then tn, then tm.
    budget = _vmem_budget_bytes()

    def resident(tm_, tk_, tn_):
        return (2 * tm_ * tk_ * x_itemsize        # x double buffer
                + 2 * tk_ * tn_ * w_itemsize      # w double buffer
                + 2 * tm_ * tn_ * out_itemsize    # out double buffer
                + 2 * tn_ * 4                     # bias double buffer
                + (tm_ * tn_ * 4 if use_acc else 0))

    while resident(tm, tk, tn) > budget and tk >= 256 and tk % 256 == 0:
        tk //= 2
    while resident(tm, tk, tn) > budget and tn >= 256 and tn % 256 == 0:
        tn //= 2
    while resident(tm, tk, tn) > budget and tm >= 2 * pack:
        tm = _round_up(tm // 2, pack)

    Mp = _round_up(B, tm)

    # Keep >= 2 M x N output tiles where divisibility allows, so v7x's two
    # TensorCores both get work from the "parallel" axes (no-op on 1-TC chips).
    if Mp // tm == 1 and Np // tn == 1 and tn % 256 == 0:
        tn //= 2

    xp = x if (Mp == B and Kp == D) else jnp.pad(x, ((0, Mp - B), (0, Kp - D)))

    grid = (Mp // tm, Np // tn, Kp // tk)

    cost = pl.CostEstimate(
        flops=2 * Mp * Kp * Np,
        transcendentals=0,
        bytes_accessed=(xp.size * x_itemsize + w.size * w_itemsize
                        + b2d.size * 4 + Mp * Np * out_itemsize),
    )

    kernel = _linear_kernel_acc if use_acc else _linear_kernel_f32_out
    scratch = [pltpu.VMEM((tm, tn), jnp.float32)] if use_acc else []

    out_padded = pl.pallas_call(
        kernel,
        out_shape=jax.ShapeDtypeStruct((Mp, Np), out_dtype),
        grid_spec=pltpu.PrefetchScalarGridSpec(
            num_scalar_prefetch=0,
            grid=grid,
            in_specs=[
                pl.BlockSpec((tm, tk), lambda i, j, k: (i, k)),
                pl.BlockSpec((tk, tn), lambda i, j, k: (k, j)),
                pl.BlockSpec((1, tn), lambda i, j, k: (0, j)),
            ],
            out_specs=pl.BlockSpec((tm, tn), lambda i, j, k: (i, j)),
            scratch_shapes=scratch,
        ),
        compiler_params=pltpu.CompilerParams(
            dimension_semantics=("parallel", "parallel", "arbitrary"),
            vmem_limit_bytes=budget,
        ),
        cost_estimate=cost,
    )(xp, w, b2d)

    if Mp == B and Np == C:
        return out_padded
    return out_padded[:B, :C]


def init_classifier_params(key, input_dim, num_classes):
    """Deterministic init matching nn.Linear's default (uniform +/- 1/sqrt(fan_in))."""
    kw, kb = jax.random.split(key)
    bound = 1.0 / jnp.sqrt(jnp.float32(input_dim))
    # PyTorch weight is [num_classes, input_dim]; store transposed for x @ w.
    w_t = jax.random.uniform(
        kw, (num_classes, input_dim), jnp.float32, -bound, bound
    )
    w = jnp.transpose(w_t)  # [input_dim, num_classes]
    b = jax.random.uniform(kb, (num_classes,), jnp.float32, -bound, bound)
    return w, b


if __name__ == "__main__":
    key = jax.random.PRNGKey(0)
    k_x, k_p = jax.random.split(key)

    batch = 8
    input_dim = 32
    num_classes = 16

    x = jax.random.normal(k_x, (batch, input_dim), jnp.float32)
    w, b = init_classifier_params(k_p, input_dim, num_classes)
    y_ref = x @ w + b[None, :]

    # f32 path (no scratch: accumulate directly into the resident f32 output).
    params_f32 = prepare_classifier_params(w, b)
    y = jax.block_until_ready(classifier_forward(x, params_f32))
    assert y.shape == (batch, num_classes)
    assert y.dtype == jnp.float32
    assert jnp.allclose(y, y_ref, atol=1e-5, rtol=1e-5)

    # bf16-compute path: weight cast + pad done once at prep time, f32 accumulate.
    params_bf16 = prepare_classifier_params(w, b, compute_dtype=jnp.bfloat16)
    y_bf16c = jax.block_until_ready(classifier_forward(x, params_bf16))
    assert y_bf16c.dtype == jnp.float32
    assert jnp.allclose(y_bf16c, y_ref, atol=3e-2, rtol=3e-2)

    # bf16-input / bf16-output path (exercises the f32 VMEM accumulator kernel).
    y_bf16 = jax.block_until_ready(
        classifier_forward(x.astype(jnp.bfloat16), params_bf16)
    )
    assert y_bf16.dtype == jnp.bfloat16
    assert jnp.allclose(y_bf16.astype(jnp.float32), y_ref, atol=5e-2, rtol=5e-2)

    print("KERNEL_OK")
</pallas_src>

<mosaic_0001>
module attributes {stable_mosaic.version = 11 : i64} {
  func.func @_linear_kernel_f32_out(%arg0: i32, %arg1: i32, %arg2: i32, %arg3: memref<8x128xf32, #tpu.memory_space<vmem>>, %arg4: memref<128x128xf32, #tpu.memory_space<vmem>>, %arg5: memref<1x128xf32, #tpu.memory_space<vmem>>, %arg6: memref<8x128xf32, #tpu.memory_space<vmem>>) attributes {dimension_semantics = [#tpu.dimension_semantics<parallel>, #tpu.dimension_semantics<parallel>, #tpu.dimension_semantics<arbitrary>], iteration_bounds = array<i64: 1, 1, 1>, scalar_prefetch = 0 : i64, scratch_operands = 0 : i64, tpu.core_type = #tpu.core_type<tc>, window_params = [{transform_indices = @transform_0, window_bounds = array<i64: 8, 128>}, {transform_indices = @transform_1, window_bounds = array<i64: 128, 128>}, {transform_indices = @transform_2, window_bounds = array<i64: 1, 128>}, {transform_indices = @transform_3, window_bounds = array<i64: 8, 128>}]} {
    %c0_i32 = arith.constant 0 : i32
    %0 = arith.cmpi eq, %arg2, %c0_i32 : i32
    %1 = arith.extui %0 : i1 to i32
    %c0_i32_0 = arith.constant 0 : i32
    %2 = arith.cmpi ne, %1, %c0_i32_0 : i32
    scf.if %2 {
      %c0_8 = arith.constant 0 : index
      %c0_9 = arith.constant 0 : index
      %9 = vector.load %arg5[%c0_8, %c0_9] : memref<1x128xf32, #tpu.memory_space<vmem>>, vector<1x128xf32>
      %10 = vector.shape_cast %9 : vector<1x128xf32> to vector<1x128xf32>
      %11 = vector.broadcast %10 : vector<1x128xf32> to vector<8x128xf32>
      %c0_10 = arith.constant 0 : index
      %c0_11 = arith.constant 0 : index
      %12 = vector.load %arg6[%c0_10, %c0_11] : memref<8x128xf32, #tpu.memory_space<vmem>>, vector<8x128xf32>
      tpu.vector_store %arg6[%c0_10, %c0_11], %11 {strides = array<i32>} : memref<8x128xf32, #tpu.memory_space<vmem>>, vector<8x128xf32>,
    } else {
    }
    %c0 = arith.constant 0 : index
    %c0_1 = arith.constant 0 : index
    %3 = vector.load %arg6[%c0, %c0_1] : memref<8x128xf32, #tpu.memory_space<vmem>>, vector<8x128xf32>
    %c0_2 = arith.constant 0 : index
    %c0_3 = arith.constant 0 : index
    %4 = vector.load %arg3[%c0_2, %c0_3] : memref<8x128xf32, #tpu.memory_space<vmem>>, vector<8x128xf32>
    %c0_4 = arith.constant 0 : index
    %c0_5 = arith.constant 0 : index
    %5 = vector.load %arg4[%c0_4, %c0_5] : memref<128x128xf32, #tpu.memory_space<vmem>>, vector<128x128xf32>
    %cst = arith.constant dense<0.000000e+00> : vector<8x128xf32>
    %6 = tpu.matmul %4, %5, %cst {dimension_numbers = #tpu.dot_dimension_numbers<[1], [0], [0], [1], [0, 0, 1, 1], [], []>} : vector<8x128xf32>, vector<128x128xf32>, vector<8x128xf32> -> vector<8x128xf32>
    %7 = arith.addf %3, %6 : vector<8x128xf32>
    %c0_6 = arith.constant 0 : index
    %c0_7 = arith.constant 0 : index
    %8 = vector.load %arg6[%c0_6, %c0_7] : memref<8x128xf32, #tpu.memory_space<vmem>>, vector<8x128xf32>
    tpu.vector_store %arg6[%c0_6, %c0_7], %7 {strides = array<i32>} : memref<8x128xf32, #tpu.memory_space<vmem>>, vector<8x128xf32>,
    return
  }
  func.func @transform_0(%arg0: i32, %arg1: i32, %arg2: i32) -> (i32, i32) {
    %c0_i32 = arith.constant 0 : i32
    return %arg0, %arg2 : i32, i32
  }
  func.func @transform_1(%arg0: i32, %arg1: i32, %arg2: i32) -> (i32, i32) {
    %c0_i32 = arith.constant 0 : i32
    return %arg2, %arg1 : i32, i32
  }
  func.func @transform_2(%arg0: i32, %arg1: i32, %arg2: i32) -> (i32, i32) {
    %c0_i32 = arith.constant 0 : i32
    %c0_i32_0 = arith.constant 0 : i32
    return %c0_i32, %arg1 : i32, i32
  }
  func.func @transform_3(%arg0: i32, %arg1: i32, %arg2: i32) -> (i32, i32) {
    %c0_i32 = arith.constant 0 : i32
    return %arg0, %arg1 : i32, i32
  }
}

</mosaic_0001>

<bundles_post_ra>
// kernel: tpu_custom_call.1
= control target key start
LH: loop header
LB: loop body
LE: loop exit
PB: predicated region body
PF: predicated region fallthrough
CT: control target
= control target key end

     0   :  { %8 = vsyncpa [#allocation3], 0  ;;  %s390_s0 = inlined_call_operand.hbm [shape: f32[8,128], index: 0, kind: input, shape index: {}]   ;;  %s391_s1 = inlined_call_operand.hbm [shape: f32[128,128], index: 1, kind: input, shape index: {}]   ;;  %s392_s2 = inlined_call_operand.vmem [shape: f32[1,128], index: 2, kind: input, shape index: {}]   ;;  %s393_s3 = inlined_call_operand.hbm [shape: f32[8,128], index: 3, kind: output, shape index: {}]  }
   0x1   :  { %9 = vsyncpa [#allocation6], 0 }
   0x2   :  { %10 = vsyncpa [#allocation4], 0  ;;  %s316_s12 = smov [#allocation2]   ;;  %s317_s14 = smov [#allocation5]  }
   0x3   :  { %s17_s13 = sshll.u32 %s316_s12, 4  ;;  %s26_s15 = sshll.u32 %s317_s14, 4  ;;  %s18_s13 = int_to_ptr.vmem [resolvable:$true] %s17_s13  ;;  %s344_s15 = int_to_ptr.vmem [resolvable:$true] %s26_s15 }
   0x4   :  { %s244_s18 = scalar_lea.hbm %s390_s0, 128 }
   0x5   :  { %p245_p0 = scmp.ne.s32.totalorder %s390_s0, %s244_s18  ;;  %p248_p1 = scmp.lt.u32.totalorder %s244_s18, %s390_s0 }
   0x7   :  { %p250_p2 = pnand %p248_p1, %p245_p0 }
   0x9   :  { %253 = shalt.err (!%p250_p2)
}
   0xa   :  { %s254_s23 = scalar_lea.vmem %s18_s13, 128  ;;  %p259_p4 = scmp.lt.s32.totalorder %s18_s13, %s18_s13 }
   0xb   :  { %p255_p3 = scmp.ne.s32.totalorder %s18_s13, %s254_s23  ;;  %p260_p5 = scmp.lt.s32.totalorder %s254_s23, %s254_s23 }
   0xd   :  { %p261_p6 = por %p260_p5, %p259_p4 }
   0xf   :  { %p262_p7 = pnand %p261_p6, %p255_p3 }
  0x11   :  { %265 = shalt.err (!%p262_p7)
}
  0x12   :  { %20 = dma.hbm_to_vmem [thread:$0]  %s390_s0, 128, %s18_s13, [#allocation3]  }
  0x13   :  { %s266_s28 = scalar_lea.hbm %s391_s1, 2048 }
  0x14   :  { %p267_p8 = scmp.ne.s32.totalorder %s391_s1, %s266_s28  ;;  %p270_p9 = scmp.lt.u32.totalorder %s266_s28, %s391_s1 }
  0x16   :  { %p272_p10 = pnand %p270_p9, %p267_p8 }
  0x18   :  { %275 = shalt.err (!%p272_p10)
}
  0x19   :  { %s276_s6 = scalar_lea.vmem %s344_s15, 2048  ;;  %p281_p12 = scmp.lt.s32.totalorder %s344_s15, %s344_s15 }
  0x1a   :  { %p277_p11 = scmp.ne.s32.totalorder %s344_s15, %s276_s6  ;;  %p282_p13 = scmp.lt.s32.totalorder %s276_s6, %s276_s6 }
  0x1c   :  { %p283_p0 = por %p282_p13, %p281_p12 }
  0x1e   :  { %p284_p1 = pnand %p283_p0, %p277_p11 }
  0x20   :  { %287 = shalt.err (!%p284_p1)
}
  0x21   :  { %s318_s0 = smov 128   ;;  %s319_s7 = smov 8  }
  0x22   :  { %32 = dma.hbm_to_vmem [thread:$0]  %s391_s1, 2048, %s344_s15, [#allocation6], %s318_s0, %s318_s0, %s319_s7  }
  0x23   :  { %310 = dma.done.wait [#allocation3], 128  }
  0x24   :  { %311 = vsyncadd [#allocation3], 4294967168 }
  0x25   :  { %312 = dma.done.wait [#allocation6], 2048  }
  0x26   :  { %313 = vsyncadd [#allocation6], 4294965248  ;;  %v320_v0 = vmov 0.0|0.0   ;;  %vm321_vm0 = vmmov 0   ;;  %v322_v1 = vmov 0.0   ;;  %v55_v2 = vld [vmem:[#allocation5] sm:$0xff] }
  0x27   :  { %212 = vmatprep.subr.bf16.mxu0 %v320_v0  ;;  %209 = vmatprep.mubr.msk.f32.mxu0 %vm321_vm0, %v322_v1  ;;  %v56_v3 = vld [vmem:[#allocation5 + $0x8] sm:$0xff]  ;;  %v57_v4 = vld [vmem:[#allocation5 + $0x10] sm:$0xff]  ;;  %v58_v6 = vld [vmem:[#allocation5 + $0x18] sm:$0xff]  ;;  %s323_s11 = smov [#allocation7]  }
  0x28   :  { %v213_v5 = vpack.c.bf16 %v56_v3, %v55_v2  ;;  %v216_v7 = vpack.c.bf16 %v58_v6, %v57_v4  ;;  %v59_v8 = vld [vmem:[#allocation5 + $0x20] sm:$0xff]  ;;  %v60_v9 = vld [vmem:[#allocation5 + $0x28] sm:$0xff]  ;;  %v61_v11 = vld [vmem:[#allocation5 + $0x30] sm:$0xff]  ;;  %s149_s12 = sshll.u32 %s323_s11, 4  ;;  %s150_s12 = int_to_ptr.vmem [resolvable:$true] %s149_s12 }
  0x29   :  { %v219_v10 = vpack.c.bf16 %v60_v9, %v59_v8  ;;  %v62_v12 = vld [vmem:[#allocation5 + $0x38] sm:$0xff]  ;;  %v63_v14 = vld [vmem:[#allocation5 + $0x40] sm:$0xff]  ;;  %v64_v15 = vld [vmem:[#allocation5 + $0x48] sm:$0xff]  ;;  %s288_s13 = scalar_lea.vmem %s150_s12, 128  ;;  %p293_p3 = scmp.lt.s32.totalorder %s150_s12, %s150_s12 }
  0x2a   :  { %214 = vmatpush3.bf16.msra.mxu0 %v213_v5  ;;  %v222_v13 = vpack.c.bf16 %v62_v12, %v61_v11  ;;  %v225_v16 = vpack.c.bf16 %v64_v15, %v63_v14  ;;  %v65_v17 = vld [vmem:[#allocation5 + $0x50] sm:$0xff]  ;;  %v66_v18 = vld [vmem:[#allocation5 + $0x58] sm:$0xff]  ;;  %v67_v20 = vld [vmem:[#allocation5 + $0x60] sm:$0xff]  ;;  %p289_p2 = scmp.ne.s32.totalorder %s150_s12, %s288_s13  ;;  %p294_p4 = scmp.lt.s32.totalorder %s288_s13, %s288_s13 }
  0x2b   :  { %215 = vmatprep.subr.bf16.mxu0 %v320_v0  ;;  %v228_v19 = vpack.c.bf16 %v66_v18, %v65_v17  ;;  %v68_v21 = vld [vmem:[#allocation5 + $0x68] sm:$0xff]  ;;  %v69_v23 = vld [vmem:[#allocation5 + $0x70] sm:$0xff]  ;;  %v70_v24 = vld [vmem:[#allocation5 + $0x78] sm:$0xff] }
  0x2c   :  { %v231_v22 = vpack.c.bf16 %v68_v21, %v67_v20  ;;  %v234_v25 = vpack.c.bf16 %v70_v24, %v69_v23  ;;  %v54_v26 = vld [vmem:[#allocation2] sm:$0xff]  ;;  %p295_p5 = por %p294_p4, %p293_p3 }
  0x2d   :  { %v159_v27 = vld [vmem:[%s392_s2] ss:$0 sm:$0xff] }
  0x2e   :  { %217 = vmatpush3.bf16.msra.mxu0 %v216_v7  ;;  %p296_p6 = pnand %p295_p5, %p289_p2 }
  0x2f   :  { %218 = vmatprep.subr.bf16.mxu0 %v320_v0 }
  0x32   :  { %220 = vmatpush3.bf16.msra.mxu0 %v219_v10 }
  0x33   :  { %221 = vmatprep.subr.bf16.mxu0 %v320_v0 }
  0x36   :  { %223 = vmatpush3.bf16.msra.mxu0 %v222_v13 }
  0x37   :  { %224 = vmatprep.subr.bf16.mxu0 %v320_v0 }
  0x3a   :  { %226 = vmatpush3.bf16.msra.mxu0 %v225_v16 }
  0x3b   :  { %227 = vmatprep.subr.bf16.mxu0 %v320_v0 }
  0x3e   :  { %229 = vmatpush3.bf16.msra.mxu0 %v228_v19 }
  0x3f   :  { %230 = vmatprep.subr.bf16.mxu0 %v320_v0 }
  0x42   :  { %232 = vmatpush3.bf16.msra.mxu0 %v231_v22 }
  0x43   :  { %233 = vmatprep.subr.bf16.mxu0 %v320_v0 }
  0x46   :  { %235 = vmatpush3.bf16.msra.mxu0 %v234_v25 }
  0x49   :  { %210 = vmatmul.mubr.f32.vlgmr.msra.gmra.mrb[0].mxu0 %v54_v26 }
 0x11c   :  { %v137_v28 = vpop.f32.mrb[0].mxu0 }
 0x11d   :  { %v141_v29 = vadd.f32 %v159_v27, %v137_v28  ;;  %v211_v30 = vpop.f32.mrb[1].mxu0 }
 0x11f   :  { %142 = vst [vmem:[#allocation7] sm:$0xff] %v141_v29 }
 0x120   :  { %299 = shalt.err (!%p296_p6)
}
 0x121   :  { %s300_s16 = scalar_lea.hbm %s393_s3, 128 }
 0x122   :  { %p301_p7 = scmp.ne.s32.totalorder %s393_s3, %s300_s16  ;;  %p304_p8 = scmp.lt.u32.totalorder %s300_s16, %s393_s3 }
 0x124   :  { %p306_p9 = pnand %p304_p8, %p301_p7 }
 0x126   :  { %309 = shalt.err (!%p306_p9)
}
 0x127   :  { %152 = dma.vmem_to_hbm [thread:$0]  %s150_s12, 128, %s393_s3, [#allocation4]  }
 0x128   :  { %314 = dma.done.wait [#allocation4], 128  }
 0x129   :  { %315 = vsyncadd [#allocation4], 4294967168 }
 0x12a   :  { %156 = vsyncpa [#allocation3], 1 }
 0x12b   :  { %157 = vsyncpa [#allocation6], 1 }
 0x12c   :  { %158 = vsyncpa [#allocation4], 1 }

</bundles_post_ra>
